<compile_context>
chip_gen: v7x
topology: tpu7x:2x2x1
jax: 0.10.0
libtpu: 0.0.40
codegen_flags: <defaults>
</compile_context>

<pallas_src>
import numpy as np
import jax
import jax.numpy as jnp
from jax.experimental import pallas as pl
from jax.experimental.pallas import tpu as pltpu

_NEG = -1.0e30     # finite "minus infinity" filler (avoids NaN in padded cols)
_LANE = 128
_SUBLANE = 8


# ----------------------------------------------------------------------------
# Pallas kernel: fused cross-entropy + argmax, questions on lanes
# ----------------------------------------------------------------------------
def _qa_loss_kernel(x_ref, label_ref, loss_ref, argmax_ref):
    # x_ref:      (V_pad, TB) logits; vocab on sublanes, questions on lanes
    # label_ref:  (1, TB) int32 ground-truth vocab index per question
    # loss_ref:   (1, TB) f32  cross-entropy (== BCE-with-logits for bool rows)
    # argmax_ref: (1, TB) i32  argmax over vocab (first maximal index)
    x = x_ref[...].astype(jnp.float32)          # in-kernel upcast (bf16 safe)
    v_pad = x.shape[0]

    m = jnp.max(x, axis=0, keepdims=True)                               # (1,TB)
    lse = m + jnp.log(jnp.sum(jnp.exp(x - m), axis=0, keepdims=True))   # (1,TB)

    vidx = jax.lax.broadcasted_iota(jnp.int32, x.shape, 0)              # (V,TB)
    lab = label_ref[...]                                                # (1,TB)
    picked = jnp.sum(jnp.where(vidx == lab, x, 0.0), axis=0, keepdims=True)
    loss_ref[...] = lse - picked

    is_max = x == m
    argmax_ref[...] = jnp.min(jnp.where(is_max, vidx, v_pad), axis=0,
                              keepdims=True)


def qa_losses(slab, labels, *, block_n=_LANE):
    """slab: (V_pad, N_pad) logits; labels: (1, N_pad) int32.
    Returns (loss (1, N_pad) f32, argmax (1, N_pad) i32)."""
    v_pad, n_pad = slab.shape
    assert n_pad % block_n == 0 and v_pad % _SUBLANE == 0
    return pl.pallas_call(
        _qa_loss_kernel,
        out_shape=(
            jax.ShapeDtypeStruct((1, n_pad), jnp.float32),
            jax.ShapeDtypeStruct((1, n_pad), jnp.int32),
        ),
        grid=(n_pad // block_n,),
        in_specs=[
            pl.BlockSpec((v_pad, block_n), lambda j: (0, j)),
            pl.BlockSpec((1, block_n), lambda j: (0, j)),
        ],
        out_specs=(
            pl.BlockSpec((1, block_n), lambda j: (0, j)),
            pl.BlockSpec((1, block_n), lambda j: (0, j)),
        ),
        compiler_params=pltpu.CompilerParams(
            dimension_semantics=("parallel",)),   # shards across TCs on v7x
    )(slab, labels)
    # TODO(synk): at production sizes (huge vocab) also tile the vocab axis
    # with an accumulator; not needed at GQA answer-vocab scale.


# ----------------------------------------------------------------------------
# Host-side module mirroring QALoss.forward semantics
# ----------------------------------------------------------------------------
class SyntheticGDef:
    op_def = {"verify": None, "query": None}

    def qtype2atype(self, qtype):
        return {"verify": "bool", "query": "concept"}[qtype]


def _round_up(x, m):
    return ((x + m - 1) // m) * m


class QALossPallas:
    def __init__(self, gdef):
        self.gdef = gdef
        self.training = True
        # TODO(synk): original loads 'data/gqa_vocab_13.json' and patches
        # relation synonyms into answer_token_to_idx; we rely on the per-answer
        # idx2word supplied with each question instead (no file I/O here).

    def forward(self, feed_dict, answers):
        outputs = {
            "answer": [],
            "loss": [],
            "is_correct": [],
            "loss_type": {
                "op": {k: [] for k in self.gdef.op_def.keys()},
                "losstype": {"bool": [], "softmax": []},
            },
        }
        answer_list, _lstm_logits, _mixing = answers
        post_process = {"to the right of": "right",
                        "to the left of": "left",
                        "in front of": "front"}

        # ---- pass 1: classify questions, collect per-question logits -------
        records = [None] * len(answer_list)
        raw_logits = []                      # device arrays, fetched in batch
        for i, (query_type, answer) in enumerate(answer_list):
            gt_raw = feed_dict["answer_raw"][i]
            rtype = self.gdef.qtype2atype(query_type)
            if rtype == "bool":
                gt = {"yes": 1.0, "no": 0.0}.get(gt_raw)
                records[i] = dict(kind="bool", qtype=query_type, gt_raw=gt_raw,
                                  gt=gt, col=len(raw_logits))
                raw_logits.append(jnp.reshape(answer[0], (-1,)))
            elif rtype in ("concept", "relation", "attribute"):
                logits, idx2word = answer[0], answer[-1]
                word2idx = {v: k for k, v in idx2word.items()}
                if gt_raw == "wooden":
                    gt = word2idx["wood"]
                elif gt_raw == "metallic":
                    gt = word2idx["metal"]
                elif gt_raw in word2idx:
                    gt = word2idx[gt_raw]
                else:
                    gt = None
                    for word in word2idx:
                        if gt_raw in word:
                            gt = word2idx[word]
                records[i] = dict(kind="softmax", qtype=query_type,
                                  gt_raw=gt_raw, gt=gt, idx2word=idx2word,
                                  col=len(raw_logits))
                raw_logits.append(jnp.reshape(logits, (-1,)))
            else:
                # Unknown query type path of the reference module.
                records[i] = dict(kind="unknown", gt_raw=gt_raw)

        n_items = len(raw_logits)
        loss_np = argmax_np = None
        if n_items:
            # Single batched device->host fetch of all input logits.
            host_logits = jax.device_get(raw_logits)
            v_max = max(max(int(l.shape[0]) for l in host_logits), 2)
            v_pad = _round_up(max(v_max, _SUBLANE), _SUBLANE)
            n_pad = _round_up(n_items, _LANE)

            slab = np.full((v_pad, n_pad), _NEG, dtype=np.float32)
            labels = np.zeros((1, n_pad), dtype=np.int32)
            for rec in records:
                if rec is None or rec["kind"] == "unknown":
                    continue
                c = rec["col"]
                if rec["kind"] == "bool":
                    x = np.asarray(host_logits[c], np.float32).reshape(-1)[0]
                    slab[0, c] = 0.0      # implicit "no" logit
                    slab[1, c] = x        # "yes" logit
                else:
                    lv = np.asarray(host_logits[c], np.float32).reshape(-1)
                    slab[: lv.shape[0], c] = lv
                labels[0, c] = 0 if rec["gt"] is None else int(rec["gt"])

            loss_dev, argmax_dev = qa_losses(slab, labels)
            # Single batched device->host fetch of all results.
            loss_h, argmax_h = jax.device_get((loss_dev, argmax_dev))
            loss_np, argmax_np = loss_h[0], argmax_h[0]

        # ---- pass 2: assemble outputs in original question order -----------
        for i, rec in enumerate(records):
            if rec is None or rec["kind"] == "unknown":
                outputs["answer"].append("yes")
                outputs["is_correct"].append(int("yes" == rec["gt_raw"]))
                continue
            c = rec["col"]
            pred = int(argmax_np[c])
            if rec["kind"] == "bool":
                ans = ["no", "yes"][pred]
                losstype = "bool"
            else:
                ans = rec["idx2word"][pred]
                if ans in post_process:
                    ans = post_process[ans]
                losstype = "softmax"
            outputs["answer"].append(ans)
            outputs["is_correct"].append(int(ans == rec["gt_raw"]))
            if self.training and rec["gt"] is not None:
                l = np.float32(loss_np[c])
                outputs["loss"].append(l)
                outputs["loss_type"]["op"][rec["qtype"]].append(float(l))
                outputs["loss_type"]["losstype"][losstype].append(float(l))
        return outputs


# ----------------------------------------------------------------------------
if __name__ == "__main__":
    key = jax.random.PRNGKey(0)
    k1, k2 = jax.random.split(key)

    V = 32           # synthetic answer-vocabulary size
    n_bool, n_soft = 4, 4

    gdef = SyntheticGDef()
    idx2word = {i: f"word{i}" for i in range(V)}
    module = QALossPallas(gdef)
    module.training = True

    bool_logits = jax.random.normal(k1, (n_bool,), dtype=jnp.float32)
    soft_logits = jax.random.normal(k2, (n_soft, V), dtype=jnp.float32)

    answer_list, answer_raw, qids = [], [], []
    for i in range(n_bool + n_soft):
        j = i // 2
        if i % 2 == 0:                                   # bool / "verify"
            answer_list.append(("verify", (bool_logits[j:j + 1],)))
            answer_raw.append("yes" if j % 2 == 0 else "no")
        else:                                            # softmax / "query"
            answer_list.append(("query", (soft_logits[j], None, idx2word)))
            answer_raw.append(f"word{(3 * j) % V}")
        qids.append(f"q{i}")

    feed_dict = {"answer_raw": answer_raw, "qid": qids,
                 "question_raw": ["?"] * (n_bool + n_soft)}
    answers = (answer_list, None, None)

    out = module.forward(feed_dict, answers)
    for l in out["loss"]:
        jax.block_until_ready(l)

    # correctness check against pure-JAX reference formulas
    ref_losses = []
    for i, (qtype, ans) in enumerate(answer_list):
        if gdef.qtype2atype(qtype) == "bool":
            x = jnp.float32(ans[0][0])
            z = {"yes": 1.0, "no": 0.0}[answer_raw[i]]
            ref_losses.append(float(jnp.maximum(x, 0.0) - x * z
                                    + jnp.log1p(jnp.exp(-jnp.abs(x)))))
        else:
            logits = ans[0]
            label = {v: k for k, v in idx2word.items()}[answer_raw[i]]
            ref_losses.append(float(jax.nn.logsumexp(logits) - logits[label]))
    np.testing.assert_allclose(np.array([float(l) for l in out["loss"]]),
                               np.array(ref_losses), rtol=1e-5, atol=1e-5)
    assert len(out["answer"]) == n_bool + n_soft
    assert len(out["is_correct"]) == n_bool + n_soft
    # bool predictions must match (logit > 0)
    for i, (qtype, ans) in enumerate(answer_list):
        if gdef.qtype2atype(qtype) == "bool":
            expect = "yes" if float(ans[0][0]) > 0 else "no"
            assert out["answer"][i] == expect

    print("KERNEL_OK")
</pallas_src>

<mosaic_0001>
module attributes {stable_mosaic.version = 11 : i64} {
  func.func @_qa_loss_kernel(%arg0: i32, %arg1: memref<32x128xf32, #tpu.memory_space<vmem>>, %arg2: memref<1x128xi32, #tpu.memory_space<vmem>>, %arg3: memref<1x128xf32, #tpu.memory_space<vmem>>, %arg4: memref<1x128xi32, #tpu.memory_space<vmem>>) attributes {dimension_semantics = [#tpu.dimension_semantics<parallel>], iteration_bounds = array<i64: 1>, scalar_prefetch = 0 : i64, scratch_operands = 0 : i64, tpu.core_type = #tpu.core_type<tc>, window_params = [{transform_indices = @transform_0, window_bounds = array<i64: 32, 128>}, {transform_indices = @transform_1, window_bounds = array<i64: 1, 128>}, {transform_indices = @transform_2, window_bounds = array<i64: 1, 128>}, {transform_indices = @transform_3, window_bounds = array<i64: 1, 128>}]} {
    %c0 = arith.constant 0 : index
    %c0_0 = arith.constant 0 : index
    %0 = vector.load %arg1[%c0, %c0_0] : memref<32x128xf32, #tpu.memory_space<vmem>>, vector<32x128xf32>
    %cst = arith.constant dense<0xFF800000> : vector<128xf32>
    %1 = vector.multi_reduction <maximumf>, %0, %cst [0] : vector<32x128xf32> to vector<128xf32>
    %2 = vector.shape_cast %1 : vector<128xf32> to vector<1x128xf32>
    %3 = vector.broadcast %2 : vector<1x128xf32> to vector<32x128xf32>
    %4 = arith.subf %0, %3 : vector<32x128xf32>
    %5 = math.exp %4 : vector<32x128xf32>
    %cst_1 = arith.constant dense<0.000000e+00> : vector<128xf32>
    %6 = vector.multi_reduction <add>, %5, %cst_1 [0] : vector<32x128xf32> to vector<128xf32>
    %7 = vector.shape_cast %6 : vector<128xf32> to vector<1x128xf32>
    %8 = math.log %7 : vector<1x128xf32>
    %9 = arith.addf %2, %8 : vector<1x128xf32>
    %10 = tpu.iota {dimensions = array<i32: 0>} : vector<32x128xi32>
    %c0_2 = arith.constant 0 : index
    %c0_3 = arith.constant 0 : index
    %11 = vector.load %arg2[%c0_2, %c0_3] : memref<1x128xi32, #tpu.memory_space<vmem>>, vector<1x128xi32>
    %12 = vector.broadcast %11 : vector<1x128xi32> to vector<32x128xi32>
    %13 = arith.cmpi eq, %10, %12 : vector<32x128xi32>
    %cst_4 = arith.constant 0.000000e+00 : f32
    %14 = vector.broadcast %cst_4 : f32 to vector<32x128xf32>
    %15 = arith.select %13, %0, %14 : vector<32x128xi1>, vector<32x128xf32>
    %cst_5 = arith.constant dense<0.000000e+00> : vector<128xf32>
    %16 = vector.multi_reduction <add>, %15, %cst_5 [0] : vector<32x128xf32> to vector<128xf32>
    %17 = vector.shape_cast %16 : vector<128xf32> to vector<1x128xf32>
    %18 = arith.subf %9, %17 : vector<1x128xf32>
    %c0_6 = arith.constant 0 : index
    %c0_7 = arith.constant 0 : index
    %19 = vector.load %arg3[%c0_6, %c0_7] : memref<1x128xf32, #tpu.memory_space<vmem>>, vector<1x128xf32>
    tpu.vector_store %arg3[%c0_6, %c0_7], %18 {strides = array<i32>} : memref<1x128xf32, #tpu.memory_space<vmem>>, vector<1x128xf32>,
    %20 = vector.broadcast %2 : vector<1x128xf32> to vector<32x128xf32>
    %21 = arith.cmpf oeq, %0, %20 : vector<32x128xf32>
    %c32_i32 = arith.constant 32 : i32
    %22 = vector.broadcast %c32_i32 : i32 to vector<32x128xi32>
    %23 = arith.select %21, %10, %22 : vector<32x128xi1>, vector<32x128xi32>
    %cst_8 = arith.constant dense<2147483647> : vector<128xi32>
    %24 = vector.multi_reduction <minsi>, %23, %cst_8 [0] : vector<32x128xi32> to vector<128xi32>
    %25 = vector.shape_cast %24 : vector<128xi32> to vector<1x128xi32>
    %c0_9 = arith.constant 0 : index
    %c0_10 = arith.constant 0 : index
    %26 = vector.load %arg4[%c0_9, %c0_10] : memref<1x128xi32, #tpu.memory_space<vmem>>, vector<1x128xi32>
    tpu.vector_store %arg4[%c0_9, %c0_10], %25 {strides = array<i32>} : memref<1x128xi32, #tpu.memory_space<vmem>>, vector<1x128xi32>,
    return
  }
  func.func @transform_0(%arg0: i32) -> (i32, i32) {
    %c0_i32 = arith.constant 0 : i32
    %c0_i32_0 = arith.constant 0 : i32
    return %c0_i32, %arg0 : i32, i32
  }
  func.func @transform_1(%arg0: i32) -> (i32, i32) {
    %c0_i32 = arith.constant 0 : i32
    %c0_i32_0 = arith.constant 0 : i32
    return %c0_i32, %arg0 : i32, i32
  }
  func.func @transform_2(%arg0: i32) -> (i32, i32) {
    %c0_i32 = arith.constant 0 : i32
    %c0_i32_0 = arith.constant 0 : i32
    return %c0_i32, %arg0 : i32, i32
  }
  func.func @transform_3(%arg0: i32) -> (i32, i32) {
    %c0_i32 = arith.constant 0 : i32
    %c0_i32_0 = arith.constant 0 : i32
    return %c0_i32, %arg0 : i32, i32
  }
}

</mosaic_0001>

<bundles_post_ra>
// kernel: tpu_custom_call.1
= control target key start
LH: loop header
LB: loop body
LE: loop exit
PB: predicated region body
PF: predicated region fallthrough
CT: control target
= control target key end

     0   :  { %9 = vsyncpa [#allocation3], 0  ;;  %s317_s0 = inlined_call_operand.hbm [shape: f32[32,128], index: 0, kind: input, shape index: {}]   ;;  %s318_s1 = inlined_call_operand.vmem [shape: s32[1,128], index: 1, kind: input, shape index: {}]   ;;  %s319_s2 = inlined_call_operand.hbm [shape: f32[1,128], index: 2, kind: output, shape index: {0}]   ;;  %s320_s3 = inlined_call_operand.hbm [shape: s32[1,128], index: 3, kind: output, shape index: {1}]  }
   0x1   :  { %10 = vsyncpa [#allocation4], 0 }
   0x2   :  { %11 = vsyncpa [#allocation7], 0  ;;  %s236_s12 = smov [#allocation2]   ;;  %s164_s16 = scalar_lea.hbm %s317_s0, 512 }
   0x3   :  { %s17_s13 = sshll.u32 %s236_s12, 4  ;;  %p165_p0 = scmp.ne.s32.totalorder %s317_s0, %s164_s16  ;;  %s18_s13 = int_to_ptr.vmem [resolvable:$true] %s17_s13 }
   0x4   :  { %p168_p1 = scmp.lt.u32.totalorder %s164_s16, %s317_s0 }
   0x6   :  { %p170_p2 = pnand %p168_p1, %p165_p0 }
   0x8   :  { %173 = shalt.err (!%p170_p2)
}
   0x9   :  { %s174_s21 = scalar_lea.vmem %s18_s13, 512  ;;  %p179_p4 = scmp.lt.s32.totalorder %s18_s13, %s18_s13 }
   0xa   :  { %p175_p3 = scmp.ne.s32.totalorder %s18_s13, %s174_s21  ;;  %p180_p5 = scmp.lt.s32.totalorder %s174_s21, %s174_s21 }
   0xc   :  { %p181_p6 = por %p180_p5, %p179_p4 }
   0xe   :  { %p182_p7 = pnand %p181_p6, %p175_p3 }
  0x10   :  { %185 = shalt.err (!%p182_p7)
}
  0x11   :  { %s237_s22 = smov 128   ;;  %s238_s23 = smov 8  }
  0x12   :  { %23 = dma.hbm_to_vmem [thread:$0]  %s317_s0, 512, %s18_s13, [#allocation3], %s237_s22, %s237_s22, %s238_s23  }
  0x13   :  { %230 = dma.done.wait [#allocation3], 512  }
  0x14   :  { %231 = vsyncadd [#allocation3], 4294966784  ;;  %v29_v0 = vld [vmem:[#allocation2] sm:$0xff]  ;;  %v30_v1 = vld [vmem:[#allocation2 + $0x8] sm:$0xff]  ;;  %v66_v9 = vlaneseq }
  0x15   :  { %v31_v2 = vld [vmem:[#allocation2 + $0x10] sm:$0xff]  ;;  %v273_v3 = vld [vmem:[#allocation2 + $0x18] sm:$0xff]  ;;  %v33_v4 = vmax.f32 %v29_v0, %v30_v1  ;;  %v148_v28 = vld [vmem:[%s318_s1] ss:$0 sm:$0xff]  ;;  %s239_s1 = smov [#allocation6]  }
  0x16   :  { %v34_v5 = vmax.f32 %v31_v2, %v273_v3  ;;  %v67_v12 = vshrl.u32 %v66_v9, 7  ;;  %s135_s27 = sshll.u32 %s239_s1, 4  ;;  %s136_s27 = int_to_ptr.vmem [resolvable:$true] %s135_s27 }
  0x17   :  { %s186_s28 = scalar_lea.vmem %s136_s27, 16  ;;  %s190_s29 = scalar_lea.vmem %s136_s27, 32 }
  0x18   :  { %v35_v6 = vmax.f32 %v33_v4, %v34_v5  ;;  %v68_v15 = vadd.s32 8, %v67_v12  ;;  %v70_v16 = vadd.s32 24, %v67_v12  ;;  %v69_v21 = vadd.s32 16, %v67_v12  ;;  %p187_p8 = scmp.ne.s32.totalorder %s136_s27, %s186_s28  ;;  %p191_p9 = scmp.lt.s32.totalorder %s136_s27, %s136_s27 }
  0x19   :  { %vm76_vm6 = vcmp.eq.s32.totalorder %v67_v12, %v148_v28  ;;  %p192_p10 = scmp.lt.s32.totalorder %s190_s29, %s186_s28 }
  0x1a   :  { %v36_v7 = vrot.slane %v35_v6, 4  ;;  %vm77_vm7 = vcmp.eq.s32.totalorder %v68_v15, %v148_v28  ;;  %v80_v35 = vsel %vm76_vm6, %v29_v0, 0.0  ;;  %vm78_vm9 = vcmp.eq.s32.totalorder %v69_v21, %v148_v28 }
  0x1b   :  { %v81_v36 = vsel %vm77_vm7, %v30_v1, 0.0  ;;  %v82_v41 = vsel %vm78_vm9, %v31_v2, 0.0  ;;  %vm79_vm11 = vcmp.eq.s32.totalorder %v70_v16, %v148_v28  ;;  %p193_p11 = por %p192_p10, %p191_p9 }
  0x1c   :  { %v37_v8 = vmax.f32 %v35_v6, %v36_v7  ;;  %v84_v38 = vadd.f32 %v81_v36, %v80_v35  ;;  %v83_v50 = vsel %vm79_vm11, %v273_v3, 0.0 }
  0x1d   :  { %p194_p12 = pnand %p193_p11, %p187_p8 }
  0x1e   :  { %v38_v10 = vrot.slane %v37_v8, 2  ;;  %v85_v47 = vadd.f32 %v84_v38, %v82_v41 }
  0x20   :  { %v39_v11 = vmax.f32 %v37_v8, %v38_v10  ;;  %v86_v53 = vadd.f32 %v85_v47, %v83_v50 }
  0x22   :  { %v40_v13 = vrot.slane %v39_v11, 1 }
  0x24   :  { %v276_v14 = vmax.f32 %v39_v11, %v40_v13 }
  0x26   :  { %v42_v17 = vsub.f32 %v29_v0, %v276_v14  ;;  %v43_v18 = vsub.f32 %v30_v1, %v276_v14  ;;  %v44_v19 = vsub.f32 %v31_v2, %v276_v14  ;;  %v45_v20 = vsub.f32 %v273_v3, %v276_v14 }
  0x27   :  { %vm95_vm0 = vcmp.eq.f32.partialorder %v29_v0, %v276_v14  ;;  %vm96_vm1 = vcmp.eq.f32.partialorder %v30_v1, %v276_v14  ;;  %vm97_vm2 = vcmp.eq.f32.partialorder %v31_v2, %v276_v14  ;;  %vm98_vm3 = vcmp.eq.f32.partialorder %v273_v3, %v276_v14 }
  0x28   :  { %v46_v22 = vmul.f32 1.442695, %v42_v17  ;;  %v48_v23 = vmul.f32 1.442695, %v43_v18  ;;  %v50_v24 = vmul.f32 1.442695, %v44_v19 }
  0x29   :  { %v52_v25 = vmul.f32 1.442695, %v45_v20  ;;  %v99_v26 = vsel %vm95_vm0, %v67_v12, 32  ;;  %v100_v27 = vsel %vm96_vm1, %v68_v15, 32  ;;  %v101_v29 = vsel %vm97_vm2, %v69_v21, 32 }
  0x2a   :  { %154 = vpow2.f32 %v46_v22  ;;  %v102_v30 = vsel %vm98_vm3, %v70_v16, 32  ;;  %vm103_vm4 = vcmp.lt.s32.totalorder %v99_v26, %v100_v27 }
  0x2b   :  { %156 = vpow2.f32 %v48_v23  ;;  %v104_v31 = vsel %vm103_vm4, %v99_v26, %v100_v27  ;;  %vm105_vm5 = vcmp.lt.s32.totalorder %v101_v29, %v102_v30 }
  0x2c   :  { %158 = vpow2.f32 %v50_v24  ;;  %v106_v32 = vsel %vm105_vm5, %v101_v29, %v102_v30 }
  0x2d   :  { %160 = vpow2.f32 %v52_v25  ;;  %vm107_vm8 = vcmp.lt.s32.totalorder %v104_v31, %v106_v32 }
  0x2e   :  { %v108_v33 = vsel %vm107_vm8, %v104_v31, %v106_v32 }
  0x2f   :  { %v109_v34 = vrot.slane %v108_v33, 4 }
  0x31   :  { %vm110_vm10 = vcmp.lt.s32.totalorder %v108_v33, %v109_v34 }
  0x32   :  { %v111_v37 = vsel %vm110_vm10, %v108_v33, %v109_v34 }
  0x33   :  { %v112_v39 = vrot.slane %v111_v37, 2 }
  0x34   :  { %v155_v40 = vpop.eup %154 }
  0x35   :  { %v157_v42 = vpop.eup %156  ;;  %vm113_vm12 = vcmp.lt.s32.totalorder %v111_v37, %v112_v39 }
  0x36   :  { %v159_v43 = vpop.eup %158  ;;  %v54_v44 = vadd.f32 %v157_v42, %v155_v40  ;;  %v114_v45 = vsel %vm113_vm12, %v111_v37, %v112_v39 }
  0x37   :  { %v161_v46 = vpop.eup %160  ;;  %v115_v48 = vrot.slane %v114_v45, 1 }
  0x38   :  { %v55_v49 = vadd.f32 %v159_v43, %v54_v44 }
  0x39   :  { %vm116_vm13 = vcmp.lt.s32.totalorder %v114_v45, %v115_v48 }
  0x3a   :  { %v56_v51 = vadd.f32 %v161_v46, %v55_v49  ;;  %v117_v52 = vsel %vm116_vm13, %v114_v45, %v115_v48 }
  0x3b   :  { %118 = vst [vmem:[#allocation6] sm:$0x1] %v117_v52 }
  0x3c   :  { %v57_v54 = vrot.slane %v56_v51, 4 }
  0x3d   :  { %197 = shalt.err (!%p194_p12)
}
  0x3e   :  { %s198_s5 = scalar_lea.hbm %s320_s3, 16 }
  0x3f   :  { %p199_p13 = scmp.ne.s32.totalorder %s320_s3, %s198_s5  ;;  %p202_p0 = scmp.lt.u32.totalorder %s198_s5, %s320_s3 }
  0x41   :  { %p204_p1 = pnand %p202_p0, %p199_p13 }
  0x43   :  { %207 = shalt.err (!%p204_p1)
}
  0x44   :  { %138 = dma.vmem_to_hbm [thread:$0]  %s136_s27, 16, %s320_s3, [#allocation7]   ;;  %v58_v55 = vadd.f32 %v57_v54, %v56_v51  ;;  %v87_v56 = vrot.slane %v86_v53, 4 }
  0x45   :  { %s240_s12 = smov [#allocation5]  }
  0x46   :  { %v59_v57 = vrot.slane %v58_v55, 2  ;;  %v88_v59 = vadd.f32 %v87_v56, %v86_v53  ;;  %s125_s13 = sshll.u32 %s240_s12, 4  ;;  %s126_s13 = int_to_ptr.vmem [resolvable:$true] %s125_s13 }
  0x47   :  { %s208_s3 = scalar_lea.vmem %s126_s13, 16  ;;  %s212_s14 = scalar_lea.vmem %s126_s13, 32 }
  0x48   :  { %v60_v58 = vadd.f32 %v59_v57, %v58_v55  ;;  %v89_v62 = vrot.slane %v88_v59, 2  ;;  %p209_p2 = scmp.ne.s32.totalorder %s126_s13, %s208_s3  ;;  %p213_p3 = scmp.lt.s32.totalorder %s126_s13, %s126_s13 }
  0x49   :  { %p214_p4 = scmp.lt.s32.totalorder %s212_s14, %s208_s3 }
  0x4a   :  { %v61_v60 = vrot.slane %v60_v58, 1  ;;  %v90_v63 = vadd.f32 %v89_v62, %v88_v59 }
  0x4b   :  { %p215_p5 = por %p214_p4, %p213_p3 }
  0x4c   :  { %v62_v61 = vadd.f32 %v61_v60, %v60_v58  ;;  %v91_v0 = vrot.slane %v90_v63, 1 }
  0x4d   :  { %p216_p6 = pnand %p215_p5, %p209_p2 }
  0x4e   :  { %162 = vlog2.f32 %v62_v61  ;;  %v92_v3 = vadd.f32 %v91_v0, %v90_v63 }
  0x58   :  { %v163_v1 = vpop.eup %162 }
  0x59   :  { %v64_v2 = vmul.f32 0.6931472, %v163_v1 }
  0x5b   :  { %v65_v4 = vadd.f32 %v64_v2, %v276_v14 }
  0x5d   :  { %v93_v5 = vsub.f32 %v65_v4, %v92_v3 }
  0x5f   :  { %94 = vst [vmem:[#allocation5] sm:$0x1] %v93_v5 }
  0x60   :  { %219 = shalt.err (!%p216_p6)
}
  0x61   :  { %s220_s17 = scalar_lea.hbm %s319_s2, 16 }
  0x62   :  { %p221_p7 = scmp.ne.s32.totalorder %s319_s2, %s220_s17  ;;  %p224_p8 = scmp.lt.u32.totalorder %s220_s17, %s319_s2 }
  0x64   :  { %p226_p9 = pnand %p224_p8, %p221_p7 }
  0x66   :  { %229 = shalt.err (!%p226_p9)
}
  0x67   :  { %128 = dma.vmem_to_hbm [thread:$0]  %s126_s13, 16, %s319_s2, [#allocation4]  }
  0x68   :  { %232 = dma.done.wait [#allocation4], 16  }
  0x69   :  { %233 = vsyncadd [#allocation4], 4294967280 }
  0x6a   :  { %234 = dma.done.wait [#allocation7], 16  }
  0x6b   :  { %235 = vsyncadd [#allocation7], 4294967280 }
  0x6c   :  { %145 = vsyncpa [#allocation3], 1 }
  0x6d   :  { %146 = vsyncpa [#allocation4], 1 }
  0x6e   :  { %147 = vsyncpa [#allocation7], 1 }

</bundles_post_ra>
